<compile_context>
chip_gen: v7x
topology: tpu7x:2x2x1
jax: 0.10.0
libtpu: 0.0.40
codegen_flags: <defaults>
</compile_context>

<pallas_src>
import math
from functools import partial

import jax
import jax.numpy as jnp
from jax.experimental import pallas as pl
from jax.experimental.pallas import tpu as pltpu


_COMPILER_PARAMS = pltpu.CompilerParams(
    dimension_semantics=("parallel",),
    vmem_limit_bytes=32 * 1024 * 1024,
)


def _layernorm(z, g, b, eps):
    mean = jnp.mean(z, axis=-1, keepdims=True)
    cen = z - mean
    var = jnp.mean(cen * cen, axis=-1, keepdims=True)
    return cen * jax.lax.rsqrt(var + eps) * g + b


# --------------------- kernel 1: input projection + PE -----------------------

def input_proj_kernel(x_ref, w_ref, b_ref, pe_ref, o_ref):
    x = x_ref[0]                                                    # (S, Fin)
    y = jnp.dot(x, w_ref[...], preferred_element_type=jnp.float32)
    o_ref[0] = (y + b_ref[...] + pe_ref[...]).astype(o_ref.dtype)


def input_projection(x, w, b, pe):
    B, S, Fin = x.shape
    D = w.shape[1]
    return pl.pallas_call(
        input_proj_kernel,
        out_shape=jax.ShapeDtypeStruct((B, S, D), x.dtype),
        grid=(B,),
        in_specs=[
            pl.BlockSpec((1, S, Fin), lambda b: (b, 0, 0)),
            pl.BlockSpec((Fin, D), lambda b: (0, 0)),
            pl.BlockSpec((1, D), lambda b: (0, 0)),
            pl.BlockSpec((S, D), lambda b: (0, 0)),
        ],
        out_specs=pl.BlockSpec((1, S, D), lambda b: (b, 0, 0)),
        compiler_params=_COMPILER_PARAMS,
    )(x, w, b, pe)


# --------------------- kernel 2: fused encoder layer -------------------------

def encoder_layer_kernel(x_ref, wqkv_ref, bqkv_ref, wo_ref, bo_ref,
                         ln1g_ref, ln1b_ref, w1_ref, b1_ref, w2_ref, b2_ref,
                         ln2g_ref, ln2b_ref, o_ref, *, nhead, eps):
    x = x_ref[0]                                                    # (S, D)
    S, D = x.shape
    dh = D // nhead
    scale = 1.0 / math.sqrt(dh)

    # ---- multi-head self-attention: packed QKV, heads batched ----
    qkv = jnp.dot(x, wqkv_ref[...], preferred_element_type=jnp.float32)
    qkv = qkv + bqkv_ref[...]                                       # (S, 3D)
    qkv_t = qkv.T                                                   # (3D, S)

    def heads(i):                                                   # -> (H, S, dh)
        m = qkv_t[i * D:(i + 1) * D, :]                             # (D, S) sublane slice
        return jnp.swapaxes(m.reshape(nhead, dh, S), 1, 2)

    q, k, v = heads(0), heads(1), heads(2)                          # (H, S, dh) each
    s = jnp.einsum('hqd,hkd->hqk', q, k,
                   preferred_element_type=jnp.float32) * scale      # (H, S, S)
    s = s - jnp.max(s, axis=-1, keepdims=True)
    p = jnp.exp(s)
    p = p * pl.reciprocal(jnp.sum(p, axis=-1, keepdims=True), approx=True)
    ctx = jnp.einsum('hqk,hkd->hqd', p, v,
                     preferred_element_type=jnp.float32)            # (H, S, dh)
    attn = jnp.swapaxes(ctx, 1, 2).reshape(D, S).T                  # (S, D)
    attn = jnp.dot(attn, wo_ref[...],
                   preferred_element_type=jnp.float32) + bo_ref[...]

    # ---- residual + LayerNorm 1 (post-norm, PyTorch default) ----
    h = _layernorm(x + attn, ln1g_ref[...], ln1b_ref[...], eps)

    # ---- feed-forward (ReLU) ----
    ff = jnp.dot(h, w1_ref[...], preferred_element_type=jnp.float32) + b1_ref[...]
    ff = jnp.maximum(ff, 0.0)
    ff = jnp.dot(ff, w2_ref[...], preferred_element_type=jnp.float32) + b2_ref[...]

    # ---- residual + LayerNorm 2 ----
    o_ref[0] = _layernorm(h + ff, ln2g_ref[...], ln2b_ref[...], eps).astype(o_ref.dtype)


def encoder_layer(h, p, *, nhead, eps=1e-5):
    B, S, D = h.shape
    F = p["w1"].shape[1]
    w_dd = pl.BlockSpec((D, D), lambda b: (0, 0))
    b_d = pl.BlockSpec((1, D), lambda b: (0, 0))
    return pl.pallas_call(
        partial(encoder_layer_kernel, nhead=nhead, eps=eps),
        out_shape=jax.ShapeDtypeStruct((B, S, D), h.dtype),
        grid=(B,),
        in_specs=[
            pl.BlockSpec((1, S, D), lambda b: (b, 0, 0)),           # x
            pl.BlockSpec((D, 3 * D), lambda b: (0, 0)),             # wqkv
            pl.BlockSpec((1, 3 * D), lambda b: (0, 0)),             # bqkv
            w_dd, b_d,                                              # wo, bo
            b_d, b_d,                                               # ln1 g, b
            pl.BlockSpec((D, F), lambda b: (0, 0)),                 # w1
            pl.BlockSpec((1, F), lambda b: (0, 0)),                 # b1
            pl.BlockSpec((F, D), lambda b: (0, 0)),                 # w2
            b_d,                                                    # b2
            b_d, b_d,                                               # ln2 g, b
        ],
        out_specs=pl.BlockSpec((1, S, D), lambda b: (b, 0, 0)),
        compiler_params=_COMPILER_PARAMS,
    )(h, p["wqkv"], p["bqkv"], p["wo"], p["bo"],
      p["ln1_g"], p["ln1_b"], p["w1"], p["b1"], p["w2"], p["b2"],
      p["ln2_g"], p["ln2_b"])


# --------------------- kernel 3: fused output projection ---------------------

def output_proj_kernel(h_ref, w1_ref, b1_ref, w2_ref, b2_ref, w3_ref, b3_ref,
                       o_ref):
    h = h_ref[0]                                                    # (S, D)
    y = jnp.dot(h, w1_ref[...], preferred_element_type=jnp.float32) + b1_ref[...]
    y = jnp.where(y >= 0.0, y, 0.01 * y)                            # LeakyReLU(0.01)
    y = jnp.dot(y, w2_ref[...], preferred_element_type=jnp.float32) + b2_ref[...]
    y = jnp.where(y >= 0.0, y, 0.01 * y)
    # final (32 -> 1) projection: VPU multiply + lane reduction (no MXU)
    out = jnp.sum(y * w3_ref[...], axis=-1, keepdims=True) + b3_ref[...]
    o_ref[0] = out.astype(o_ref.dtype)


def output_projection(h, w1, b1, w2, b2, w3_row, b3):
    B, S, D = h.shape
    N1 = w1.shape[1]
    N2 = w2.shape[1]
    return pl.pallas_call(
        output_proj_kernel,
        out_shape=jax.ShapeDtypeStruct((B, S, 1), h.dtype),
        grid=(B,),
        in_specs=[
            pl.BlockSpec((1, S, D), lambda b: (b, 0, 0)),
            pl.BlockSpec((D, N1), lambda b: (0, 0)),
            pl.BlockSpec((1, N1), lambda b: (0, 0)),
            pl.BlockSpec((N1, N2), lambda b: (0, 0)),
            pl.BlockSpec((1, N2), lambda b: (0, 0)),
            pl.BlockSpec((1, N2), lambda b: (0, 0)),
            pl.BlockSpec((1, 1), lambda b: (0, 0)),
        ],
        out_specs=pl.BlockSpec((1, S, 1), lambda b: (b, 0, 0)),
        compiler_params=_COMPILER_PARAMS,
    )(h, w1, b1, w2, b2, w3_row, b3)


# ------------------------------- glue ----------------------------------------

def positional_encoding(seq_len, d_model):
    position = jnp.arange(seq_len, dtype=jnp.float32)[:, None]
    div_term = jnp.exp(jnp.arange(0, d_model, 2, dtype=jnp.float32)
                       * (-math.log(10000.0) / d_model))
    pe = jnp.zeros((seq_len, d_model), dtype=jnp.float32)
    pe = pe.at[:, 0::2].set(jnp.sin(position * div_term))
    pe = pe.at[:, 1::2].set(jnp.cos(position * div_term))
    return pe


def init_params(key, input_dim, d_model, nhead, num_layers, dim_ff):
    def w(k, shape, scale=0.05):
        return (scale * jax.random.normal(k, shape)).astype(jnp.float32)

    keys = iter(jax.random.split(key, 8 + 4 * num_layers))
    params = {
        "wi": w(next(keys), (input_dim, d_model)),
        "bi": jnp.zeros((1, d_model), jnp.float32),
        "layers": [],
    }
    for _ in range(num_layers):
        params["layers"].append({
            "wqkv": w(next(keys), (d_model, 3 * d_model)),   # [Wq | Wk | Wv] packed
            "bqkv": jnp.zeros((1, 3 * d_model), jnp.float32),
            "wo": w(next(keys), (d_model, d_model)),
            "bo": jnp.zeros((1, d_model), jnp.float32),
            "ln1_g": jnp.ones((1, d_model), jnp.float32),
            "ln1_b": jnp.zeros((1, d_model), jnp.float32),
            "w1": w(next(keys), (d_model, dim_ff)),
            "b1": jnp.zeros((1, dim_ff), jnp.float32),
            "w2": w(next(keys), (dim_ff, d_model)),
            "b2": jnp.zeros((1, d_model), jnp.float32),
            "ln2_g": jnp.ones((1, d_model), jnp.float32),
            "ln2_b": jnp.zeros((1, d_model), jnp.float32),
        })
    params["wo1"] = w(next(keys), (d_model, 64))
    params["bo1"] = jnp.zeros((1, 64), jnp.float32)
    params["wo2"] = w(next(keys), (64, 32))
    params["bo2"] = jnp.zeros((1, 32), jnp.float32)
    params["wo3"] = w(next(keys), (1, 32))        # final (32 -> 1) weight stored as a row
    params["bo3"] = jnp.zeros((1, 1), jnp.float32)
    return params


def forward(x, params, *, nhead):
    _, S, _ = x.shape
    d_model = params["wi"].shape[1]

    pe = positional_encoding(S, d_model)          # (S, D), passed once (no tiling)
    h = input_projection(x, params["wi"], params["bi"], pe)

    for p in params["layers"]:                    # one fused pallas_call per layer
        h = encoder_layer(h, p, nhead=nhead)

    return output_projection(h, params["wo1"], params["bo1"],
                             params["wo2"], params["bo2"],
                             params["wo3"], params["bo3"])


if __name__ == "__main__":
    B, S = 2, 8
    input_dim, d_model, nhead, num_layers, dim_ff = 16, 32, 4, 2, 64

    key = jax.random.PRNGKey(0)
    kx, kp = jax.random.split(key)
    x = jax.random.normal(kx, (B, S, input_dim), dtype=jnp.float32)
    params = init_params(kp, input_dim, d_model, nhead, num_layers, dim_ff)

    fwd = jax.jit(partial(forward, nhead=nhead))
    out = fwd(x, params)
    jax.block_until_ready(out)
    assert out.shape == (B, S, 1) and out.dtype == jnp.float32
    print("KERNEL_OK")
</pallas_src>

<mosaic_0001>
module attributes {stable_mosaic.version = 11 : i64} {
  func.func @encoder_layer_kernel(%arg0: i32, %arg1: memref<1x8x32xf32, #tpu.memory_space<vmem>>, %arg2: memref<32x96xf32, #tpu.memory_space<vmem>>, %arg3: memref<1x96xf32, #tpu.memory_space<vmem>>, %arg4: memref<32x32xf32, #tpu.memory_space<vmem>>, %arg5: memref<1x32xf32, #tpu.memory_space<vmem>>, %arg6: memref<1x32xf32, #tpu.memory_space<vmem>>, %arg7: memref<1x32xf32, #tpu.memory_space<vmem>>, %arg8: memref<32x64xf32, #tpu.memory_space<vmem>>, %arg9: memref<1x64xf32, #tpu.memory_space<vmem>>, %arg10: memref<64x32xf32, #tpu.memory_space<vmem>>, %arg11: memref<1x32xf32, #tpu.memory_space<vmem>>, %arg12: memref<1x32xf32, #tpu.memory_space<vmem>>, %arg13: memref<1x32xf32, #tpu.memory_space<vmem>>, %arg14: memref<1x8x32xf32, #tpu.memory_space<vmem>>) attributes {dimension_semantics = [#tpu.dimension_semantics<parallel>], iteration_bounds = array<i64: 2>, scalar_prefetch = 0 : i64, scratch_operands = 0 : i64, tpu.core_type = #tpu.core_type<tc>, window_params = [{transform_indices = @transform_0, window_bounds = array<i64: 1, 8, 32>}, {pipeline_mode = #tpu.pipeline_mode<synchronous>, transform_indices = @transform_1, window_bounds = array<i64: 32, 96>}, {pipeline_mode = #tpu.pipeline_mode<synchronous>, transform_indices = @transform_2, window_bounds = array<i64: 1, 96>}, {pipeline_mode = #tpu.pipeline_mode<synchronous>, transform_indices = @transform_3, window_bounds = array<i64: 32, 32>}, {pipeline_mode = #tpu.pipeline_mode<synchronous>, transform_indices = @transform_4, window_bounds = array<i64: 1, 32>}, {pipeline_mode = #tpu.pipeline_mode<synchronous>, transform_indices = @transform_5, window_bounds = array<i64: 1, 32>}, {pipeline_mode = #tpu.pipeline_mode<synchronous>, transform_indices = @transform_6, window_bounds = array<i64: 1, 32>}, {pipeline_mode = #tpu.pipeline_mode<synchronous>, transform_indices = @transform_7, window_bounds = array<i64: 32, 64>}, {pipeline_mode = #tpu.pipeline_mode<synchronous>, transform_indices = @transform_8, window_bounds = array<i64: 1, 64>}, {pipeline_mode = #tpu.pipeline_mode<synchronous>, transform_indices = @transform_9, window_bounds = array<i64: 64, 32>}, {pipeline_mode = #tpu.pipeline_mode<synchronous>, transform_indices = @transform_10, window_bounds = array<i64: 1, 32>}, {pipeline_mode = #tpu.pipeline_mode<synchronous>, transform_indices = @transform_11, window_bounds = array<i64: 1, 32>}, {pipeline_mode = #tpu.pipeline_mode<synchronous>, transform_indices = @transform_12, window_bounds = array<i64: 1, 32>}, {transform_indices = @transform_13, window_bounds = array<i64: 1, 8, 32>}]} {
    %c0 = arith.constant 0 : index
    %c0_0 = arith.constant 0 : index
    %c0_1 = arith.constant 0 : index
    %0 = vector.load %arg1[%c0, %c0_0, %c0_1] : memref<1x8x32xf32, #tpu.memory_space<vmem>>, vector<1x8x32xf32>
    %1 = vector.shape_cast %0 : vector<1x8x32xf32> to vector<8x32xf32>
    %c0_2 = arith.constant 0 : index
    %c0_3 = arith.constant 0 : index
    %2 = vector.load %arg2[%c0_2, %c0_3] : memref<32x96xf32, #tpu.memory_space<vmem>>, vector<32x96xf32>
    %cst = arith.constant dense<0.000000e+00> : vector<8x96xf32>
    %3 = tpu.matmul %1, %2, %cst {dimension_numbers = #tpu.dot_dimension_numbers<[1], [0], [0], [1], [0, 0, 1, 1], [], []>} : vector<8x32xf32>, vector<32x96xf32>, vector<8x96xf32> -> vector<8x96xf32>
    %c0_4 = arith.constant 0 : index
    %c0_5 = arith.constant 0 : index
    %4 = vector.load %arg3[%c0_4, %c0_5] : memref<1x96xf32, #tpu.memory_space<vmem>>, vector<1x96xf32>
    %5 = vector.broadcast %4 : vector<1x96xf32> to vector<8x96xf32>
    %6 = arith.addf %3, %5 : vector<8x96xf32>
    %7 = tpu.transpose %6, [1, 0] : vector<8x96xf32> -> vector<96x8xf32>
    %8 = vector.extract_strided_slice %7 {offsets = [0, 0], sizes = [32, 8], strides = [1, 1]} : vector<96x8xf32> to vector<32x8xf32>
    %9 = vector.shape_cast %8 : vector<32x8xf32> to vector<4x8x8xf32>
    %10 = tpu.transpose %9, [0, 2, 1] : vector<4x8x8xf32> -> vector<4x8x8xf32>
    %11 = vector.extract_strided_slice %7 {offsets = [32, 0], sizes = [32, 8], strides = [1, 1]} : vector<96x8xf32> to vector<32x8xf32>
    %12 = vector.shape_cast %11 : vector<32x8xf32> to vector<4x8x8xf32>
    %13 = tpu.transpose %12, [0, 2, 1] : vector<4x8x8xf32> -> vector<4x8x8xf32>
    %14 = vector.extract_strided_slice %7 {offsets = [64, 0], sizes = [32, 8], strides = [1, 1]} : vector<96x8xf32> to vector<32x8xf32>
    %15 = vector.shape_cast %14 : vector<32x8xf32> to vector<4x8x8xf32>
    %16 = tpu.transpose %15, [0, 2, 1] : vector<4x8x8xf32> -> vector<4x8x8xf32>
    "tpu.trace_start"() <{level = 10 : i32, message = "hqd,hkd->hqk"}> : () -> ()
    %cst_6 = arith.constant dense<0.000000e+00> : vector<4x8x8xf32>
    %17 = tpu.matmul %10, %13, %cst_6 {dimension_numbers = #tpu.dot_dimension_numbers<[2], [2], [1], [1], [0, 0, 0, 1, 1, 1], [0], [0]>} : vector<4x8x8xf32>, vector<4x8x8xf32>, vector<4x8x8xf32> -> vector<4x8x8xf32>
    "tpu.trace_stop"() : () -> ()
    %cst_7 = arith.constant 0.353553385 : f32
    %18 = vector.broadcast %cst_7 : f32 to vector<4x8x8xf32>
    %19 = arith.mulf %17, %18 : vector<4x8x8xf32>
    %cst_8 = arith.constant dense<0xFF800000> : vector<4x8xf32>
    %20 = vector.multi_reduction <maximumf>, %19, %cst_8 [2] : vector<4x8x8xf32> to vector<4x8xf32>
    %21 = vector.shape_cast %20 : vector<4x8xf32> to vector<4x8x1xf32>
    %22 = vector.broadcast %21 : vector<4x8x1xf32> to vector<4x8x8xf32>
    %23 = arith.subf %19, %22 : vector<4x8x8xf32>
    %24 = math.exp %23 : vector<4x8x8xf32>
    %cst_9 = arith.constant dense<0.000000e+00> : vector<4x8xf32>
    %25 = vector.multi_reduction <add>, %24, %cst_9 [2] : vector<4x8x8xf32> to vector<4x8xf32>
    %26 = vector.shape_cast %25 : vector<4x8xf32> to vector<4x8x1xf32>
    %27 = tpu.reciprocal %26 {approx = true} : vector<4x8x1xf32> -> vector<4x8x1xf32>
    %28 = vector.broadcast %27 : vector<4x8x1xf32> to vector<4x8x8xf32>
    %29 = arith.mulf %24, %28 : vector<4x8x8xf32>
    "tpu.trace_start"() <{level = 10 : i32, message = "hqk,hkd->hqd"}> : () -> ()
    %cst_10 = arith.constant dense<0.000000e+00> : vector<4x8x8xf32>
    %30 = tpu.matmul %29, %16, %cst_10 {dimension_numbers = #tpu.dot_dimension_numbers<[2], [1], [1], [2], [0, 0, 0, 1, 1, 2], [0], [0]>} : vector<4x8x8xf32>, vector<4x8x8xf32>, vector<4x8x8xf32> -> vector<4x8x8xf32>
    "tpu.trace_stop"() : () -> ()
    %31 = tpu.transpose %30, [0, 2, 1] : vector<4x8x8xf32> -> vector<4x8x8xf32>
    %32 = vector.shape_cast %31 : vector<4x8x8xf32> to vector<32x8xf32>
    %33 = tpu.transpose %32, [1, 0] : vector<32x8xf32> -> vector<8x32xf32>
    %c0_11 = arith.constant 0 : index
    %c0_12 = arith.constant 0 : index
    %34 = vector.load %arg4[%c0_11, %c0_12] : memref<32x32xf32, #tpu.memory_space<vmem>>, vector<32x32xf32>
    %cst_13 = arith.constant dense<0.000000e+00> : vector<8x32xf32>
    %35 = tpu.matmul %33, %34, %cst_13 {dimension_numbers = #tpu.dot_dimension_numbers<[1], [0], [0], [1], [0, 0, 1, 1], [], []>} : vector<8x32xf32>, vector<32x32xf32>, vector<8x32xf32> -> vector<8x32xf32>
    %c0_14 = arith.constant 0 : index
    %c0_15 = arith.constant 0 : index
    %36 = vector.load %arg5[%c0_14, %c0_15] : memref<1x32xf32, #tpu.memory_space<vmem>>, vector<1x32xf32>
    %37 = vector.broadcast %36 : vector<1x32xf32> to vector<8x32xf32>
    %38 = arith.addf %35, %37 : vector<8x32xf32>
    %39 = arith.addf %1, %38 : vector<8x32xf32>
    %c0_16 = arith.constant 0 : index
    %c0_17 = arith.constant 0 : index
    %40 = vector.load %arg6[%c0_16, %c0_17] : memref<1x32xf32, #tpu.memory_space<vmem>>, vector<1x32xf32>
    %c0_18 = arith.constant 0 : index
    %c0_19 = arith.constant 0 : index
    %41 = vector.load %arg7[%c0_18, %c0_19] : memref<1x32xf32, #tpu.memory_space<vmem>>, vector<1x32xf32>
    %cst_20 = arith.constant dense<0.000000e+00> : vector<8xf32>
    %42 = vector.multi_reduction <add>, %39, %cst_20 [1] : vector<8x32xf32> to vector<8xf32>
    %43 = vector.shape_cast %42 : vector<8xf32> to vector<8x1xf32>
    %cst_21 = arith.constant 3.200000e+01 : f32
    %44 = vector.broadcast %cst_21 : f32 to vector<8x1xf32>
    %45 = arith.divf %43, %44 : vector<8x1xf32>
    %46 = vector.broadcast %45 : vector<8x1xf32> to vector<8x32xf32>
    %47 = arith.subf %39, %46 : vector<8x32xf32>
    %48 = arith.mulf %47, %47 : vector<8x32xf32>
    %cst_22 = arith.constant dense<0.000000e+00> : vector<8xf32>
    %49 = vector.multi_reduction <add>, %48, %cst_22 [1] : vector<8x32xf32> to vector<8xf32>
    %50 = vector.shape_cast %49 : vector<8xf32> to vector<8x1xf32>
    %cst_23 = arith.constant 3.200000e+01 : f32
    %51 = vector.broadcast %cst_23 : f32 to vector<8x1xf32>
    %52 = arith.divf %50, %51 : vector<8x1xf32>
    %cst_24 = arith.constant 9.99999974E-6 : f32
    %53 = vector.broadcast %cst_24 : f32 to vector<8x1xf32>
    %54 = arith.addf %52, %53 : vector<8x1xf32>
    %55 = math.rsqrt %54 : vector<8x1xf32>
    %56 = vector.broadcast %55 : vector<8x1xf32> to vector<8x32xf32>
    %57 = arith.mulf %47, %56 : vector<8x32xf32>
    %58 = vector.broadcast %40 : vector<1x32xf32> to vector<8x32xf32>
    %59 = arith.mulf %57, %58 : vector<8x32xf32>
    %60 = vector.broadcast %41 : vector<1x32xf32> to vector<8x32xf32>
    %61 = arith.addf %59, %60 : vector<8x32xf32>
    %c0_25 = arith.constant 0 : index
    %c0_26 = arith.constant 0 : index
    %62 = vector.load %arg8[%c0_25, %c0_26] : memref<32x64xf32, #tpu.memory_space<vmem>>, vector<32x64xf32>
    %cst_27 = arith.constant dense<0.000000e+00> : vector<8x64xf32>
    %63 = tpu.matmul %61, %62, %cst_27 {dimension_numbers = #tpu.dot_dimension_numbers<[1], [0], [0], [1], [0, 0, 1, 1], [], []>} : vector<8x32xf32>, vector<32x64xf32>, vector<8x64xf32> -> vector<8x64xf32>
    %c0_28 = arith.constant 0 : index
    %c0_29 = arith.constant 0 : index
    %64 = vector.load %arg9[%c0_28, %c0_29] : memref<1x64xf32, #tpu.memory_space<vmem>>, vector<1x64xf32>
    %65 = vector.broadcast %64 : vector<1x64xf32> to vector<8x64xf32>
    %66 = arith.addf %63, %65 : vector<8x64xf32>
    %cst_30 = arith.constant 0.000000e+00 : f32
    %67 = vector.broadcast %cst_30 : f32 to vector<8x64xf32>
    %68 = arith.maximumf %66, %67 : vector<8x64xf32>
    %c0_31 = arith.constant 0 : index
    %c0_32 = arith.constant 0 : index
    %69 = vector.load %arg10[%c0_31, %c0_32] : memref<64x32xf32, #tpu.memory_space<vmem>>, vector<64x32xf32>
    %cst_33 = arith.constant dense<0.000000e+00> : vector<8x32xf32>
    %70 = tpu.matmul %68, %69, %cst_33 {dimension_numbers = #tpu.dot_dimension_numbers<[1], [0], [0], [1], [0, 0, 1, 1], [], []>} : vector<8x64xf32>, vector<64x32xf32>, vector<8x32xf32> -> vector<8x32xf32>
    %c0_34 = arith.constant 0 : index
    %c0_35 = arith.constant 0 : index
    %71 = vector.load %arg11[%c0_34, %c0_35] : memref<1x32xf32, #tpu.memory_space<vmem>>, vector<1x32xf32>
    %72 = vector.broadcast %71 : vector<1x32xf32> to vector<8x32xf32>
    %73 = arith.addf %70, %72 : vector<8x32xf32>
    %74 = arith.addf %61, %73 : vector<8x32xf32>
    %c0_36 = arith.constant 0 : index
    %c0_37 = arith.constant 0 : index
    %75 = vector.load %arg12[%c0_36, %c0_37] : memref<1x32xf32, #tpu.memory_space<vmem>>, vector<1x32xf32>
    %c0_38 = arith.constant 0 : index
    %c0_39 = arith.constant 0 : index
    %76 = vector.load %arg13[%c0_38, %c0_39] : memref<1x32xf32, #tpu.memory_space<vmem>>, vector<1x32xf32>
    %cst_40 = arith.constant dense<0.000000e+00> : vector<8xf32>
    %77 = vector.multi_reduction <add>, %74, %cst_40 [1] : vector<8x32xf32> to vector<8xf32>
    %78 = vector.shape_cast %77 : vector<8xf32> to vector<8x1xf32>
    %cst_41 = arith.constant 3.200000e+01 : f32
    %79 = vector.broadcast %cst_41 : f32 to vector<8x1xf32>
    %80 = arith.divf %78, %79 : vector<8x1xf32>
    %81 = vector.broadcast %80 : vector<8x1xf32> to vector<8x32xf32>
    %82 = arith.subf %74, %81 : vector<8x32xf32>
    %83 = arith.mulf %82, %82 : vector<8x32xf32>
    %cst_42 = arith.constant dense<0.000000e+00> : vector<8xf32>
    %84 = vector.multi_reduction <add>, %83, %cst_42 [1] : vector<8x32xf32> to vector<8xf32>
    %85 = vector.shape_cast %84 : vector<8xf32> to vector<8x1xf32>
    %cst_43 = arith.constant 3.200000e+01 : f32
    %86 = vector.broadcast %cst_43 : f32 to vector<8x1xf32>
    %87 = arith.divf %85, %86 : vector<8x1xf32>
    %cst_44 = arith.constant 9.99999974E-6 : f32
    %88 = vector.broadcast %cst_44 : f32 to vector<8x1xf32>
    %89 = arith.addf %87, %88 : vector<8x1xf32>
    %90 = math.rsqrt %89 : vector<8x1xf32>
    %91 = vector.broadcast %90 : vector<8x1xf32> to vector<8x32xf32>
    %92 = arith.mulf %82, %91 : vector<8x32xf32>
    %93 = vector.broadcast %75 : vector<1x32xf32> to vector<8x32xf32>
    %94 = arith.mulf %92, %93 : vector<8x32xf32>
    %95 = vector.broadcast %76 : vector<1x32xf32> to vector<8x32xf32>
    %96 = arith.addf %94, %95 : vector<8x32xf32>
    %c0_45 = arith.constant 0 : index
    %c0_46 = arith.constant 0 : index
    %c0_47 = arith.constant 0 : index
    %97 = vector.load %arg14[%c0_45, %c0_46, %c0_47] : memref<1x8x32xf32, #tpu.memory_space<vmem>>, vector<1x8x32xf32>
    %98 = vector.shape_cast %97 : vector<1x8x32xf32> to vector<8x32xf32>
    %99 = vector.shape_cast %96 : vector<8x32xf32> to vector<1x8x32xf32>
    tpu.vector_store %arg14[%c0_45, %c0_46, %c0_47], %99 {strides = array<i32>} : memref<1x8x32xf32, #tpu.memory_space<vmem>>, vector<1x8x32xf32>,
    return
  }
  func.func @transform_0(%arg0: i32) -> (i32, i32, i32) {
    %c0_i32 = arith.constant 0 : i32
    %c0_i32_0 = arith.constant 0 : i32
    %c0_i32_1 = arith.constant 0 : i32
    return %arg0, %c0_i32, %c0_i32_0 : i32, i32, i32
  }
  func.func @transform_1(%arg0: i32) -> (i32, i32) {
    %c0_i32 = arith.constant 0 : i32
    %c0_i32_0 = arith.constant 0 : i32
    %c0_i32_1 = arith.constant 0 : i32
    return %c0_i32, %c0_i32_0 : i32, i32
  }
  func.func @transform_2(%arg0: i32) -> (i32, i32) {
    %c0_i32 = arith.constant 0 : i32
    %c0_i32_0 = arith.constant 0 : i32
    %c0_i32_1 = arith.constant 0 : i32
    return %c0_i32, %c0_i32_0 : i32, i32
  }
  func.func @transform_3(%arg0: i32) -> (i32, i32) {
    %c0_i32 = arith.constant 0 : i32
    %c0_i32_0 = arith.constant 0 : i32
    %c0_i32_1 = arith.constant 0 : i32
    return %c0_i32, %c0_i32_0 : i32, i32
  }
  func.func @transform_4(%arg0: i32) -> (i32, i32) {
    %c0_i32 = arith.constant 0 : i32
    %c0_i32_0 = arith.constant 0 : i32
    %c0_i32_1 = arith.constant 0 : i32
    return %c0_i32, %c0_i32_0 : i32, i32
  }
  func.func @transform_5(%arg0: i32) -> (i32, i32) {
    %c0_i32 = arith.constant 0 : i32
    %c0_i32_0 = arith.constant 0 : i32
    %c0_i32_1 = arith.constant 0 : i32
    return %c0_i32, %c0_i32_0 : i32, i32
  }
  func.func @transform_6(%arg0: i32) -> (i32, i32) {
    %c0_i32 = arith.constant 0 : i32
    %c0_i32_0 = arith.constant 0 : i32
    %c0_i32_1 = arith.constant 0 : i32
    return %c0_i32, %c0_i32_0 : i32, i32
  }
  func.func @transform_7(%arg0: i32) -> (i32, i32) {
    %c0_i32 = arith.constant 0 : i32
    %c0_i32_0 = arith.constant 0 : i32
    %c0_i32_1 = arith.constant 0 : i32
    return %c0_i32, %c0_i32_0 : i32, i32
  }
  func.func @transform_8(%arg0: i32) -> (i32, i32) {
    %c0_i32 = arith.constant 0 : i32
    %c0_i32_0 = arith.constant 0 : i32
    %c0_i32_1 = arith.constant 0 : i32
    return %c0_i32, %c0_i32_0 : i32, i32
  }
  func.func @transform_9(%arg0: i32) -> (i32, i32) {
    %c0_i32 = arith.constant 0 : i32
    %c0_i32_0 = arith.constant 0 : i32
    %c0_i32_1 = arith.constant 0 : i32
    return %c0_i32, %c0_i32_0 : i32, i32
  }
  func.func @transform_10(%arg0: i32) -> (i32, i32) {
    %c0_i32 = arith.constant 0 : i32
    %c0_i32_0 = arith.constant 0 : i32
    %c0_i32_1 = arith.constant 0 : i32
    return %c0_i32, %c0_i32_0 : i32, i32
  }
  func.func @transform_11(%arg0: i32) -> (i32, i32) {
    %c0_i32 = arith.constant 0 : i32
    %c0_i32_0 = arith.constant 0 : i32
    %c0_i32_1 = arith.constant 0 : i32
    return %c0_i32, %c0_i32_0 : i32, i32
  }
  func.func @transform_12(%arg0: i32) -> (i32, i32) {
    %c0_i32 = arith.constant 0 : i32
    %c0_i32_0 = arith.constant 0 : i32
    %c0_i32_1 = arith.constant 0 : i32
    return %c0_i32, %c0_i32_0 : i32, i32
  }
  func.func @transform_13(%arg0: i32) -> (i32, i32, i32) {
    %c0_i32 = arith.constant 0 : i32
    %c0_i32_0 = arith.constant 0 : i32
    %c0_i32_1 = arith.constant 0 : i32
    return %arg0, %c0_i32, %c0_i32_0 : i32, i32, i32
  }
}

module attributes {stable_mosaic.version = 11 : i64} {
  func.func @output_proj_kernel(%arg0: i32, %arg1: memref<1x8x32xf32, #tpu.memory_space<vmem>>, %arg2: memref<32x64xf32, #tpu.memory_space<vmem>>, %arg3: memref<1x64xf32, #tpu.memory_space<vmem>>, %arg4: memref<64x32xf32, #tpu.memory_space<vmem>>, %arg5: memref<1x32xf32, #tpu.memory_space<vmem>>, %arg6: memref<1x32xf32, #tpu.memory_space<vmem>>, %arg7: memref<1x1xf32, #tpu.memory_space<vmem>>, %arg8: memref<1x8x1xf32, #tpu.memory_space<vmem>>) attributes {dimension_semantics = [#tpu.dimension_semantics<parallel>], iteration_bounds = array<i64: 2>, scalar_prefetch = 0 : i64, scratch_operands = 0 : i64, tpu.core_type = #tpu.core_type<tc>, window_params = [{transform_indices = @transform_0, window_bounds = array<i64: 1, 8, 32>}, {pipeline_mode = #tpu.pipeline_mode<synchronous>, transform_indices = @transform_1, window_bounds = array<i64: 32, 64>}, {pipeline_mode = #tpu.pipeline_mode<synchronous>, transform_indices = @transform_2, window_bounds = array<i64: 1, 64>}, {pipeline_mode = #tpu.pipeline_mode<synchronous>, transform_indices = @transform_3, window_bounds = array<i64: 64, 32>}, {pipeline_mode = #tpu.pipeline_mode<synchronous>, transform_indices = @transform_4, window_bounds = array<i64: 1, 32>}, {pipeline_mode = #tpu.pipeline_mode<synchronous>, transform_indices = @transform_5, window_bounds = array<i64: 1, 32>}, {pipeline_mode = #tpu.pipeline_mode<synchronous>, transform_indices = @transform_6, window_bounds = array<i64: 1, 1>}, {transform_indices = @transform_7, window_bounds = array<i64: 1, 8, 1>}]} {
    %c0 = arith.constant 0 : index
    %c0_0 = arith.constant 0 : index
    %c0_1 = arith.constant 0 : index
    %0 = vector.load %arg1[%c0, %c0_0, %c0_1] : memref<1x8x32xf32, #tpu.memory_space<vmem>>, vector<1x8x32xf32>
    %1 = vector.shape_cast %0 : vector<1x8x32xf32> to vector<8x32xf32>
    %c0_2 = arith.constant 0 : index
    %c0_3 = arith.constant 0 : index
    %2 = vector.load %arg2[%c0_2, %c0_3] : memref<32x64xf32, #tpu.memory_space<vmem>>, vector<32x64xf32>
    %cst = arith.constant dense<0.000000e+00> : vector<8x64xf32>
    %3 = tpu.matmul %1, %2, %cst {dimension_numbers = #tpu.dot_dimension_numbers<[1], [0], [0], [1], [0, 0, 1, 1], [], []>} : vector<8x32xf32>, vector<32x64xf32>, vector<8x64xf32> -> vector<8x64xf32>
    %c0_4 = arith.constant 0 : index
    %c0_5 = arith.constant 0 : index
    %4 = vector.load %arg3[%c0_4, %c0_5] : memref<1x64xf32, #tpu.memory_space<vmem>>, vector<1x64xf32>
    %5 = vector.broadcast %4 : vector<1x64xf32> to vector<8x64xf32>
    %6 = arith.addf %3, %5 : vector<8x64xf32>
    %cst_6 = arith.constant 0.000000e+00 : f32
    %7 = vector.broadcast %cst_6 : f32 to vector<8x64xf32>
    %8 = arith.cmpf oge, %6, %7 : vector<8x64xf32>
    %cst_7 = arith.constant 0.00999999977 : f32
    %9 = vector.broadcast %cst_7 : f32 to vector<8x64xf32>
    %10 = arith.mulf %9, %6 : vector<8x64xf32>
    %11 = arith.select %8, %6, %10 : vector<8x64xi1>, vector<8x64xf32>
    %c0_8 = arith.constant 0 : index
    %c0_9 = arith.constant 0 : index
    %12 = vector.load %arg4[%c0_8, %c0_9] : memref<64x32xf32, #tpu.memory_space<vmem>>, vector<64x32xf32>
    %cst_10 = arith.constant dense<0.000000e+00> : vector<8x32xf32>
    %13 = tpu.matmul %11, %12, %cst_10 {dimension_numbers = #tpu.dot_dimension_numbers<[1], [0], [0], [1], [0, 0, 1, 1], [], []>} : vector<8x64xf32>, vector<64x32xf32>, vector<8x32xf32> -> vector<8x32xf32>
    %c0_11 = arith.constant 0 : index
    %c0_12 = arith.constant 0 : index
    %14 = vector.load %arg5[%c0_11, %c0_12] : memref<1x32xf32, #tpu.memory_space<vmem>>, vector<1x32xf32>
    %15 = vector.broadcast %14 : vector<1x32xf32> to vector<8x32xf32>
    %16 = arith.addf %13, %15 : vector<8x32xf32>
    %cst_13 = arith.constant 0.000000e+00 : f32
    %17 = vector.broadcast %cst_13 : f32 to vector<8x32xf32>
    %18 = arith.cmpf oge, %16, %17 : vector<8x32xf32>
    %cst_14 = arith.constant 0.00999999977 : f32
    %19 = vector.broadcast %cst_14 : f32 to vector<8x32xf32>
    %20 = arith.mulf %19, %16 : vector<8x32xf32>
    %21 = arith.select %18, %16, %20 : vector<8x32xi1>, vector<8x32xf32>
    %c0_15 = arith.constant 0 : index
    %c0_16 = arith.constant 0 : index
    %22 = vector.load %arg6[%c0_15, %c0_16] : memref<1x32xf32, #tpu.memory_space<vmem>>, vector<1x32xf32>
    %23 = vector.broadcast %22 : vector<1x32xf32> to vector<8x32xf32>
    %24 = arith.mulf %21, %23 : vector<8x32xf32>
    %cst_17 = arith.constant dense<0.000000e+00> : vector<8xf32>
    %25 = vector.multi_reduction <add>, %24, %cst_17 [1] : vector<8x32xf32> to vector<8xf32>
    %26 = vector.shape_cast %25 : vector<8xf32> to vector<8x1xf32>
    %c0_18 = arith.constant 0 : index
    %c0_19 = arith.constant 0 : index
    %27 = vector.load %arg7[%c0_18, %c0_19] : memref<1x1xf32, #tpu.memory_space<vmem>>, vector<1x1xf32>
    %28 = vector.broadcast %27 : vector<1x1xf32> to vector<8x1xf32>
    %29 = arith.addf %26, %28 : vector<8x1xf32>
    %c0_20 = arith.constant 0 : index
    %c0_21 = arith.constant 0 : index
    %c0_22 = arith.constant 0 : index
    %30 = vector.load %arg8[%c0_20, %c0_21, %c0_22] : memref<1x8x1xf32, #tpu.memory_space<vmem>>, vector<1x8x1xf32>
    %31 = vector.shape_cast %30 : vector<1x8x1xf32> to vector<8x1xf32>
    %32 = vector.shape_cast %29 : vector<8x1xf32> to vector<1x8x1xf32>
    tpu.vector_store %arg8[%c0_20, %c0_21, %c0_22], %32 {strides = array<i32>} : memref<1x8x1xf32, #tpu.memory_space<vmem>>, vector<1x8x1xf32>,
    return
  }
  func.func @transform_0(%arg0: i32) -> (i32, i32, i32) {
    %c0_i32 = arith.constant 0 : i32
    %c0_i32_0 = arith.constant 0 : i32
    %c0_i32_1 = arith.constant 0 : i32
    return %arg0, %c0_i32, %c0_i32_0 : i32, i32, i32
  }
  func.func @transform_1(%arg0: i32) -> (i32, i32) {
    %c0_i32 = arith.constant 0 : i32
    %c0_i32_0 = arith.constant 0 : i32
    %c0_i32_1 = arith.constant 0 : i32
    return %c0_i32, %c0_i32_0 : i32, i32
  }
  func.func @transform_2(%arg0: i32) -> (i32, i32) {
    %c0_i32 = arith.constant 0 : i32
    %c0_i32_0 = arith.constant 0 : i32
    %c0_i32_1 = arith.constant 0 : i32
    return %c0_i32, %c0_i32_0 : i32, i32
  }
  func.func @transform_3(%arg0: i32) -> (i32, i32) {
    %c0_i32 = arith.constant 0 : i32
    %c0_i32_0 = arith.constant 0 : i32
    %c0_i32_1 = arith.constant 0 : i32
    return %c0_i32, %c0_i32_0 : i32, i32
  }
  func.func @transform_4(%arg0: i32) -> (i32, i32) {
    %c0_i32 = arith.constant 0 : i32
    %c0_i32_0 = arith.constant 0 : i32
    %c0_i32_1 = arith.constant 0 : i32
    return %c0_i32, %c0_i32_0 : i32, i32
  }
  func.func @transform_5(%arg0: i32) -> (i32, i32) {
    %c0_i32 = arith.constant 0 : i32
    %c0_i32_0 = arith.constant 0 : i32
    %c0_i32_1 = arith.constant 0 : i32
    return %c0_i32, %c0_i32_0 : i32, i32
  }
  func.func @transform_6(%arg0: i32) -> (i32, i32) {
    %c0_i32 = arith.constant 0 : i32
    %c0_i32_0 = arith.constant 0 : i32
    %c0_i32_1 = arith.constant 0 : i32
    return %c0_i32, %c0_i32_0 : i32, i32
  }
  func.func @transform_7(%arg0: i32) -> (i32, i32, i32) {
    %c0_i32 = arith.constant 0 : i32
    %c0_i32_0 = arith.constant 0 : i32
    %c0_i32_1 = arith.constant 0 : i32
    return %arg0, %c0_i32, %c0_i32_0 : i32, i32, i32
  }
}

module attributes {stable_mosaic.version = 11 : i64} {
  func.func @input_proj_kernel(%arg0: i32, %arg1: memref<1x8x16xf32, #tpu.memory_space<vmem>>, %arg2: memref<16x32xf32, #tpu.memory_space<vmem>>, %arg3: memref<1x32xf32, #tpu.memory_space<vmem>>, %arg4: memref<8x32xf32, #tpu.memory_space<vmem>>, %arg5: memref<1x8x32xf32, #tpu.memory_space<vmem>>) attributes {dimension_semantics = [#tpu.dimension_semantics<parallel>], iteration_bounds = array<i64: 2>, scalar_prefetch = 0 : i64, scratch_operands = 0 : i64, tpu.core_type = #tpu.core_type<tc>, window_params = [{transform_indices = @transform_0, window_bounds = array<i64: 1, 8, 16>}, {pipeline_mode = #tpu.pipeline_mode<synchronous>, transform_indices = @transform_1, window_bounds = array<i64: 16, 32>}, {pipeline_mode = #tpu.pipeline_mode<synchronous>, transform_indices = @transform_2, window_bounds = array<i64: 1, 32>}, {pipeline_mode = #tpu.pipeline_mode<synchronous>, transform_indices = @transform_3, window_bounds = array<i64: 8, 32>}, {transform_indices = @transform_4, window_bounds = array<i64: 1, 8, 32>}]} {
    %c0 = arith.constant 0 : index
    %c0_0 = arith.constant 0 : index
    %c0_1 = arith.constant 0 : index
    %0 = vector.load %arg1[%c0, %c0_0, %c0_1] : memref<1x8x16xf32, #tpu.memory_space<vmem>>, vector<1x8x16xf32>
    %1 = vector.shape_cast %0 : vector<1x8x16xf32> to vector<8x16xf32>
    %c0_2 = arith.constant 0 : index
    %c0_3 = arith.constant 0 : index
    %2 = vector.load %arg2[%c0_2, %c0_3] : memref<16x32xf32, #tpu.memory_space<vmem>>, vector<16x32xf32>
    %cst = arith.constant dense<0.000000e+00> : vector<8x32xf32>
    %3 = tpu.matmul %1, %2, %cst {dimension_numbers = #tpu.dot_dimension_numbers<[1], [0], [0], [1], [0, 0, 1, 1], [], []>} : vector<8x16xf32>, vector<16x32xf32>, vector<8x32xf32> -> vector<8x32xf32>
    %c0_4 = arith.constant 0 : index
    %c0_5 = arith.constant 0 : index
    %4 = vector.load %arg3[%c0_4, %c0_5] : memref<1x32xf32, #tpu.memory_space<vmem>>, vector<1x32xf32>
    %5 = vector.broadcast %4 : vector<1x32xf32> to vector<8x32xf32>
    %6 = arith.addf %3, %5 : vector<8x32xf32>
    %c0_6 = arith.constant 0 : index
    %c0_7 = arith.constant 0 : index
    %7 = vector.load %arg4[%c0_6, %c0_7] : memref<8x32xf32, #tpu.memory_space<vmem>>, vector<8x32xf32>
    %8 = arith.addf %6, %7 : vector<8x32xf32>
    %c0_8 = arith.constant 0 : index
    %c0_9 = arith.constant 0 : index
    %c0_10 = arith.constant 0 : index
    %9 = vector.load %arg5[%c0_8, %c0_9, %c0_10] : memref<1x8x32xf32, #tpu.memory_space<vmem>>, vector<1x8x32xf32>
    %10 = vector.shape_cast %9 : vector<1x8x32xf32> to vector<8x32xf32>
    %11 = vector.shape_cast %8 : vector<8x32xf32> to vector<1x8x32xf32>
    tpu.vector_store %arg5[%c0_8, %c0_9, %c0_10], %11 {strides = array<i32>} : memref<1x8x32xf32, #tpu.memory_space<vmem>>, vector<1x8x32xf32>,
    return
  }
  func.func @transform_0(%arg0: i32) -> (i32, i32, i32) {
    %c0_i32 = arith.constant 0 : i32
    %c0_i32_0 = arith.constant 0 : i32
    %c0_i32_1 = arith.constant 0 : i32
    return %arg0, %c0_i32, %c0_i32_0 : i32, i32, i32
  }
  func.func @transform_1(%arg0: i32) -> (i32, i32) {
    %c0_i32 = arith.constant 0 : i32
    %c0_i32_0 = arith.constant 0 : i32
    %c0_i32_1 = arith.constant 0 : i32
    return %c0_i32, %c0_i32_0 : i32, i32
  }
  func.func @transform_2(%arg0: i32) -> (i32, i32) {
    %c0_i32 = arith.constant 0 : i32
    %c0_i32_0 = arith.constant 0 : i32
    %c0_i32_1 = arith.constant 0 : i32
    return %c0_i32, %c0_i32_0 : i32, i32
  }
  func.func @transform_3(%arg0: i32) -> (i32, i32) {
    %c0_i32 = arith.constant 0 : i32
    %c0_i32_0 = arith.constant 0 : i32
    %c0_i32_1 = arith.constant 0 : i32
    return %c0_i32, %c0_i32_0 : i32, i32
  }
  func.func @transform_4(%arg0: i32) -> (i32, i32, i32) {
    %c0_i32 = arith.constant 0 : i32
    %c0_i32_0 = arith.constant 0 : i32
    %c0_i32_1 = arith.constant 0 : i32
    return %arg0, %c0_i32, %c0_i32_0 : i32, i32, i32
  }
}

</mosaic_0001>

<bundles_post_ra>
// kernel: forward.7
= control target key start
LH: loop header
LB: loop body
LE: loop exit
PB: predicated region body
PF: predicated region fallthrough
CT: control target
= control target key end

     0   :  { %s673_s26 = smov 0   ;;  %s744_s0 = inlined_call_operand.vmem [shape: f32[2,8,32], index: 0, kind: input, shape index: {}]   ;;  %s745_s1 = inlined_call_operand.vmem [shape: f32[32,64], index: 1, kind: input, shape index: {}]   ;;  %s746_s2 = inlined_call_operand.vmem [shape: f32[1,64], index: 2, kind: input, shape index: {}]   ;;  %s747_s3 = inlined_call_operand.vmem [shape: f32[64,32], index: 3, kind: input, shape index: {}]   ;;  %s748_s4 = inlined_call_operand.vmem [shape: f32[1,32], index: 4, kind: input, shape index: {}]   ;;  %s749_s5 = inlined_call_operand.vmem [shape: f32[1,32], index: 5, kind: input, shape index: {}]   ;;  %s750_s6 = inlined_call_operand.<no memory space> [shape: f32[1,1], index: 6, kind: input, shape index: {}]   ;;  %s751_s7 = inlined_call_operand.vmem [shape: f32[2,8,1], index: 7, kind: output, shape index: {}]  }
   0x1   :  { %v12_v0 = vstv %s750_s6 }
   0x2   :  { %13 = vst [vmem:[#allocation2] sm:$0x1] %v12_v0 }
   0x3 LB: > { %s531_s27 = sadd.s32 4294967295, %s625_s26   ;;  %p535_p0 = scmp.ge.s32.totalorder %s625_s26, 1  ;;  %s625_s26 = sphi %s673_s26, %s19_s26  }
   0x4   : > { %p238_p1 = scmp.lt.s32.totalorder %s625_s26, 3 }
   0x6   : > { %p239_p2 = pnand %p535_p0, %p238_p1 }
   0x7   : > { %v277_v1 = vld [vmem:[%s745_s1] sm:$0xff] (!%p239_p2)  ;;  %v278_v2 = vld [vmem:[%s745_s1 + $0x8] sm:$0xff] (!%p239_p2)  ;;  %v279_v3 = vld [vmem:[%s745_s1 + $0x10] sm:$0xff] (!%p239_p2)  ;;  %v627_v4 = vmov (!%p239_p2), 0.0|0.0   ;;  %vm628_vm0 = vmmov (!%p239_p2), 0   ;;  %v629_v7 = vmov (!%p239_p2), 0.0  }
   0x8   : > { %242 = sbr.rel (%p239_p2) target bundleno = 601 (0x259), region = 48  ;;  %590 = vmatprep.subr.bf16.mxu0 (!%p239_p2), %v627_v4  ;;  %v591_v5 = vpack.c.bf16 (!%p239_p2), %v278_v2, %v277_v1  ;;  %v280_v6 = vld [vmem:[%s745_s1 + $0x18] sm:$0xff] (!%p239_p2)  ;;  %568 = vmatprep.mubr.msk.f32.mxu0 (!%p239_p2), %vm628_vm0, %v629_v7  ;;  %p268_p3 = scmp.lt.s32.totalorder (!%p239_p2), %s531_s27, 1  ;;  %v365_v8 = vld [vmem:[%s747_s3] sm:$0xff] (!%p239_p2)  ;;  %v366_v9 = vld [vmem:[%s747_s3 + $0x8] sm:$0xff] (!%p239_p2)  ;;  %vm288_vm1 = vcmask (!%p239_p2), 261120  }
   0x9   : > { %596 = vmatprep.subr.bf16.mxu1 (!%p239_p2), %v627_v4  ;;  %v597_v10 = vpack.c.bf16 (!%p239_p2), %v366_v9, %v365_v8  ;;  %v367_v11 = vld [vmem:[%s747_s3 + $0x10] sm:$0xff] (!%p239_p2)  ;;  %v368_v12 = vld [vmem:[%s747_s3 + $0x18] sm:$0xff] (!%p239_p2)  ;;  %587 = vmatprep.mubr.msk.f32.mxu1 (!%p239_p2), %vm628_vm0, %v629_v7  ;;  %v594_v13 = vpack.c.bf16 (!%p239_p2), %v280_v6, %v279_v3  ;;  %v369_v15 = vld [vmem:[%s747_s3 + $0x20] sm:$0xff] (!%p239_p2)  ;;  %vm380_vm3 = vcmask (!%p239_p2), 523264   ;;  %vm476_vm5 = vcmask (!%p239_p2), 7168  }
   0xa   : > { %592 = vmatpush3.bf16.msra.mxu0 (!%p239_p2), %v591_v5  ;;  %v600_v14 = vpack.c.bf16 (!%p239_p2), %v368_v12, %v367_v11  ;;  %v370_v16 = vld [vmem:[%s747_s3 + $0x28] sm:$0xff] (!%p239_p2)  ;;  %v371_v19 = vld [vmem:[%s747_s3 + $0x30] sm:$0xff] (!%p239_p2)  ;;  %v372_v20 = vld [vmem:[%s747_s3 + $0x38] sm:$0xff] (!%p239_p2) }
   0xb   : > { %593 = vmatprep.subr.bf16.mxu0 (!%p239_p2), %v627_v4  ;;  %598 = vmatpush3.bf16.msra.mxu1 (!%p239_p2), %v597_v10  ;;  %v603_v18 = vpack.c.bf16 (!%p239_p2), %v370_v16, %v369_v15  ;;  %v606_v21 = vpack.c.bf16 (!%p239_p2), %v372_v20, %v371_v19  ;;  %v538_v22 = vld [vmem:[%s746_s2] ss:$0 sm:$0xff] (!%p239_p2) }
   0xc   : > { %599 = vmatprep.subr.bf16.mxu1 (!%p239_p2), %v627_v4  ;;  %v540_v28 = vld [vmem:[%s748_s4] ss:$0 sm:$0xff] (!%p239_p2) }
   0xd   : > { %v542_v33 = vld [vmem:[%s749_s5] ss:$0 sm:$0xff] (!%p239_p2) }
   0xe   : > { %595 = vmatpush3.bf16.msra.mxu0 (!%p239_p2), %v594_v13  ;;  %v543_v37 = vld [vmem:[#allocation2] ss:$0 sm:$0xff] (!%p239_p2) }
   0xf   : > { %s753_s27 = smov (!%p268_p3, %s531_s27), 1  ;;  %601 = vmatpush3.bf16.msra.mxu1 %v600_v14 }
  0x10   : > { %s536_s20 = sshll.u32 %s753_s27, 3  ;;  %602 = vmatprep.subr.bf16.mxu1 %v627_v4 }
  0x11   : > { %s271_s29 = scalar_lea.vmem %s744_s0, %s536_s20  ;;  %s275_s18 = scalar_lea.vmem %s751_s7, %s536_s20 }
  0x12   : > { %v276_v17 = vld [vmem:[%s271_s29] sm:$0xff] }
  0x13   : > { %569 = vmatmul.mubr.msk.f32.vlgmr.msra.gmra.mrb[0].mxu0 %vm288_vm1, %v276_v17  ;;  %604 = vmatpush3.bf16.msra.mxu1 %v603_v18 }
  0x14   : > { %605 = vmatprep.subr.bf16.mxu1 %v627_v4 }
  0x17   : > { %607 = vmatpush3.bf16.msra.mxu1 %v606_v21 }
  0xe6   : > { %v358_v23 = vpop.f32.mrb[0].mxu0 }
  0xe7   : > { %v359_v24 = vadd.f32 %v538_v22, %v358_v23  ;;  %v570_v25 = vpop.f32.mrb[1].mxu0 }
  0xe9   : > { %vm362_vm2 = vcmp.ge.f32.partialorder %v359_v24, 0.0  ;;  %v363_v26 = vmul.f32 0.01, %v359_v24 }
  0xeb   : > { %v364_v27 = vsel %vm362_vm2, %v359_v24, %v363_v26 }
  0xec   : > { %588 = vmatmul.mubr.msk.f32.vlgmr.msra.gmra.mrb[0].mxu1 %vm380_vm3, %v364_v27 }
 0x1bf   : > { %v450_v29 = vpop.f32.mrb[0].mxu1 }
 0x1c0   : > { %v451_v30 = vadd.f32 %v540_v28, %v450_v29  ;;  %v589_v31 = vpop.f32.mrb[1].mxu1 }
 0x1c2   : > { %v455_v32 = vmul.f32 0.01, %v451_v30  ;;  %vm454_vm4 = vcmp.ge.f32.partialorder %v451_v30, 0.0 }
 0x1c4   : > { %v456_v34 = vsel %vm454_vm4, %v451_v30, %v455_v32 }
 0x1c5   : > { %v464_v35 = vmul.f32 %v542_v33, %v456_v34 }
 0x1c7   : > { %v465_v36 = vsel %vm288_vm1, %v464_v35, 0.0 }
 0x1c8   : > { %466 = vadd.xlane.f32.xlu0 %v465_v36 }
 0x255   : > { %v467_v38 = vpop.xlane.xlu0 %466 }
 0x256   : > { %v475_v39 = vadd.f32 %v543_v37, %v467_v38 }
 0x258   : > { %477 = vst.msk [vmem:[%s275_s18] sm:$0xff] %vm476_vm5, %v475_v39 }
 0x259 PF: > { %s19_s26 = sadd.s32 1, %s625_s26  }
 0x25a   : > { %p16_p4 = scmp.ge.s32.totalorder %s19_s26, 4  }
 0x25c   :  { %18 = sbr.rel (!%p16_p4) target bundleno = 3 (0x3), region = 78 }

// kernel: forward.4
= control target key start
LH: loop header
LB: loop body
LE: loop exit
PB: predicated region body
PF: predicated region fallthrough
CT: control target
= control target key end

     0   :  { %s405_s15 = smov 0   ;;  %s434_s0 = inlined_call_operand.vmem [shape: f32[2,8,16], index: 0, kind: input, shape index: {}]   ;;  %s435_s1 = inlined_call_operand.vmem [shape: f32[16,32], index: 1, kind: input, shape index: {}]   ;;  %s436_s2 = inlined_call_operand.vmem [shape: f32[1,32], index: 2, kind: input, shape index: {}]   ;;  %s437_s3 = inlined_call_operand.vmem [shape: f32[8,32], index: 3, kind: input, shape index: {}]   ;;  %s438_s4 = inlined_call_operand.vmem [shape: f32[2,8,32], index: 4, kind: output, shape index: {}]  }
   0x1 LB: > { %s334_s16 = sadd.s32 4294967295, %s375_s15   ;;  %p338_p0 = scmp.ge.s32.totalorder %s375_s15, 1  ;;  %s375_s15 = sphi %s405_s15, %s14_s15  }
   0x2   : > { %p161_p1 = scmp.lt.s32.totalorder %s375_s15, 3 }
   0x4   : > { %p162_p2 = pnand %p338_p0, %p161_p1 }
   0x5   : > { %v194_v0 = vld [vmem:[%s435_s1] sm:$0xff] (!%p162_p2)  ;;  %v195_v1 = vld [vmem:[%s435_s1 + $0x8] sm:$0xff] (!%p162_p2)  ;;  %p185_p3 = scmp.lt.s32.totalorder (!%p162_p2), %s334_s16, 1  ;;  %v377_v2 = vmov (!%p162_p2), 0.0|0.0   ;;  %vm378_vm0 = vmmov (!%p162_p2), 0   ;;  %v379_v4 = vmov (!%p162_p2), 0.0  }
   0x6   : > { %165 = sbr.rel (%p162_p2) target bundleno = 234 (0xea), region = 36  ;;  %355 = vmatprep.subr.bf16.mxu0 (!%p162_p2), %v377_v2  ;;  %v356_v3 = vpack.c.bf16 (!%p162_p2), %v195_v1, %v194_v0  ;;  %352 = vmatprep.mubr.msk.f32.mxu0 (!%p162_p2), %vm378_vm0, %v379_v4  ;;  %vm203_vm1 = vcmask (!%p162_p2), 130048   ;;  %v341_v6 = vld [vmem:[%s436_s2] ss:$0 sm:$0xff] (!%p162_p2)  ;;  %vm279_vm2 = vcmask (!%p162_p2), 261120  }
   0x7   : > { %v277_v8 = vld [vmem:[%s437_s3] sm:$0xff] (!%p162_p2) }
   0x8   : > { %357 = vmatpush3.bf16.msra.mxu0 (!%p162_p2), %v356_v3 }
   0xd   : > { %s440_s16 = smov (!%p185_p3, %s334_s16), 1 }
   0xe   : > { %s339_s21 = sshll.u32 %s440_s16, 3 }
   0xf   : > { %s188_s24 = scalar_lea.vmem %s434_s0, %s339_s21  ;;  %s192_s5 = scalar_lea.vmem %s438_s4, %s339_s21 }
  0x10   : > { %v193_v5 = vld [vmem:[%s188_s24] sm:$0xff] }
  0x11   : > { %353 = vmatmul.mubr.msk.f32.vlgmr.msra.gmra.mrb[0].mxu0 %vm203_vm1, %v193_v5 }
  0xe4   : > { %v273_v7 = vpop.f32.mrb[0].mxu0 }
  0xe5   : > { %v274_v9 = vadd.f32 %v341_v6, %v273_v7  ;;  %v354_v10 = vpop.f32.mrb[1].mxu0 }
  0xe7   : > { %v278_v11 = vadd.f32 %v277_v8, %v274_v9 }
  0xe9   : > { %280 = vst.msk [vmem:[%s192_s5] sm:$0xff] %vm279_vm2, %v278_v11 }
  0xea PF: > { %s14_s15 = sadd.s32 1, %s375_s15  }
  0xeb   : > { %p11_p4 = scmp.ge.s32.totalorder %s14_s15, 4  }
  0xed   :  { %13 = sbr.rel (!%p11_p4) target bundleno = 1 (0x1), region = 66 }

// kernel: forward.5
= control target key start
LH: loop header
LB: loop body
LE: loop exit
PB: predicated region body
PF: predicated region fallthrough
CT: control target
= control target key end

     0   :  { %s2167_s25 = smov 0   ;;  %s2355_s0 = inlined_call_operand.vmem [shape: f32[2,8,32], index: 0, kind: input, shape index: {}]   ;;  %s2356_s1 = inlined_call_operand.vmem [shape: f32[32,96], index: 1, kind: input, shape index: {}]   ;;  %s2357_s2 = inlined_call_operand.vmem [shape: f32[1,96], index: 2, kind: input, shape index: {}]   ;;  %s2358_s3 = inlined_call_operand.vmem [shape: f32[32,32], index: 3, kind: input, shape index: {}]   ;;  %s2359_s4 = inlined_call_operand.vmem [shape: f32[1,32], index: 4, kind: input, shape index: {}]   ;;  %s2360_s5 = inlined_call_operand.vmem [shape: f32[1,32], index: 5, kind: input, shape index: {}]   ;;  %s2361_s6 = inlined_call_operand.vmem [shape: f32[1,32], index: 6, kind: input, shape index: {}]   ;;  %s2362_s7 = inlined_call_operand.vmem [shape: f32[32,64], index: 7, kind: input, shape index: {}]   ;;  %s2363_s8 = inlined_call_operand.vmem [shape: f32[1,64], index: 8, kind: input, shape index: {}]   ;;  %s2364_s9 = inlined_call_operand.vmem [shape: f32[64,32], index: 9, kind: input, shape index: {}]   ;;  %s2365_s10 = inlined_call_operand.vmem [shape: f32[1,32], index: 10, kind: input, shape index: {}]   ;;  %s2366_s11 = inlined_call_operand.vmem [shape: f32[1,32], index: 11, kind: input, shape index: {}]   ;;  %s2367_s12 = inlined_call_operand.vmem [shape: f32[1,32], index: 12, kind: input, shape index: {}]   ;;  %s2368_s13 = inlined_call_operand.vmem [shape: f32[2,8,32], index: 13, kind: output, shape index: {}]  }
   0x1 LB: > { %s1860_s26 = sadd.s32 4294967295, %s2092_s25   ;;  %p1864_p0 = scmp.ge.s32.totalorder %s2092_s25, 1  ;;  %s2092_s25 = sphi %s2167_s25, %s23_s25  }
   0x2   : > { %p386_p1 = scmp.lt.s32.totalorder %s2092_s25, 3 }
   0x4   : > { %p387_p2 = pnand %p1864_p0, %p386_p1 }
   0x5   : > { %v437_v0 = vld [vmem:[%s2356_s1] sm:$0xff] (!%p387_p2)  ;;  %v438_v1 = vld [vmem:[%s2356_s1 + $0x8] sm:$0xff] (!%p387_p2)  ;;  %v439_v2 = vld [vmem:[%s2356_s1 + $0x10] sm:$0xff] (!%p387_p2)  ;;  %v2094_v3 = vmov (!%p387_p2), 0.0|0.0   ;;  %vm2095_vm0 = vmmov (!%p387_p2), 0   ;;  %v2096_v6 = vmov (!%p387_p2), 0.0  }
   0x6   : > { %390 = sbr.rel (%p387_p2) target bundleno = 2762 (0xaca), region = 72  ;;  %2025 = vmatprep.subr.bf16.mxu0 (!%p387_p2), %v2094_v3  ;;  %v2026_v4 = vpack.c.bf16 (!%p387_p2), %v438_v1, %v437_v0  ;;  %v440_v5 = vld [vmem:[%s2356_s1 + $0x18] sm:$0xff] (!%p387_p2)  ;;  %1941 = vmatprep.mubr.msk.f32.mxu0 (!%p387_p2), %vm2095_vm0, %v2096_v6  ;;  %p428_p3 = scmp.lt.s32.totalorder (!%p387_p2), %s1860_s26, 1  ;;  %vm448_vm1 = vcmask (!%p387_p2), 261120   ;;  %v1867_v9 = vld [vmem:[%s2357_s2] ss:$0 sm:$0xff] (!%p387_p2) }
   0x7   : > { %1944 = vmatprep.subr.mxu1 (!%p387_p2), %v2096_v6  ;;  %1946 = vmatprep.mubr.msk.f32.mxu1 (!%p387_p2), %vm2095_vm0, %v2096_v6  ;;  %v2029_v7 = vpack.c.bf16 (!%p387_p2), %v440_v5, %v439_v2  ;;  %vm682_vm2 = vcmask (!%p387_p2), 64512   ;;  %vm1702_vm3 = vcmask (!%p387_p2), 523264  }
   0x8   : > { %2027 = vmatpush3.bf16.msra.mxu0 (!%p387_p2), %v2026_v4 }
   0x9   : > { %2028 = vmatprep.subr.bf16.mxu0 (!%p387_p2), %v2094_v3 }
   0xc   : > { %2030 = vmatpush3.bf16.msra.mxu0 (!%p387_p2), %v2029_v7 }
   0xd   : > { %s2370_s26 = smov (!%p428_p3, %s1860_s26), 1  ;;  %1959 = vmatprep.subr.mxu0 %v2096_v6 }
   0xe   : > { %s1865_s18 = sshll.u32 %s2370_s26, 3 }
   0xf   : > { %s431_s21 = scalar_lea.vmem %s2355_s0, %s1865_s18  ;;  %s435_s15 = scalar_lea.vmem %s2368_s13, %s1865_s18 }
  0x10   : > { %v2202_v8 = vld [vmem:[%s431_s21] sm:$0xff] }
  0x11   : > { %1942 = vmatmul.mubr.msk.f32.vlgmr.msra.gmra.mrb[0].mxu0 %vm448_vm1, %v2202_v8 }
  0x12   : > { %1961 = vmatprep.mubr.msk.f32.mxu0 %vm2095_vm0, %v2096_v6 }
  0xe4   : > { %v518_v10 = vpop.f32.mrb[0].mxu0 }
  0xe5   : > { %v1943_v11 = vpop.f32.mrb[1].mxu0  ;;  %v519_v12 = vadd.f32 %v1867_v9, %v518_v10 }
  0xe7   : > { %522 = vxpose.xlu0.b32.start.end [1/1] (short) (narrow) %v519_v12, 96 }
 0x167   : > { %v538_v13 = vpop.trf.xlu0 }
 0x168   : > { %554 = vxpose.xlu0.b32.start.end [1/1] (short) (narrow) %v538_v13, 8 }
 0x16b   : > { %v539_v14 = vpop.trf.xlu0 }
 0x16c   : > { %586 = vxpose.xlu1.b32.start.end [1/1] (short) (narrow) %v539_v14, 8 }
 0x16f   : > { %v540_v15 = vpop.trf.xlu0 }
 0x170   : > { %618 = vxpose.xlu1.b32.start.end [1/1] (short) (narrow) %v540_v15, 8 }
 0x173   : > { %v541_v16 = vpop.trf.xlu0 }
 0x174   : > { %650 = vxpose.xlu1.b32.start.end [1/1] (short) (narrow) %v541_v16, 8 }
 0x177   : > { %v542_v17 = vpop.trf.xlu0 }
 0x178   : > { %1945 = vmatpush3.msra.mxu1 %v542_v17 }
 0x179   : > { %1949 = vmatprep.subr.mxu1 %v2096_v6 }
 0x17b   : > { %v543_v18 = vpop.trf.xlu0 }
 0x17f   : > { %v544_v19 = vpop.trf.xlu0 }
 0x183   : > { %v545_v20 = vpop.trf.xlu0 }
 0x184   : > { %1960 = vmatpush3.msra.mxu0 %v545_v20 }
 0x185   : > { %1969 = vmatprep.subr.mxu0 %v2096_v6 }
 0x187   : > { %v546_v21 = vpop.trf.xlu0 }
 0x18b   : > { %v547_v22 = vpop.trf.xlu0 }
 0x18f   : > { %v2214_v23 = vpop.trf.xlu0 }
 0x193   : > { %v2216_v24 = vpop.trf.xlu0 }
 0x1e8   : > { %v570_v25 = vpop.trf.xlu0 }
 0x1e9   : > { %1947 = vmatmul.mubr.msk.f32.vlgmr.msra.gmra.mrb[0].mxu1 %vm682_vm2, %v570_v25  ;;  %v1488_v25 = vld [vmem:[%s2358_s3 + $0x8] sm:$0xff] }
 0x1ea   : > { %1950 = vmatpush3.msra.mxu1 %v543_v18  ;;  %1951 = vmatprep.mubr.msk.f32.mxu1 %vm2095_vm0, %v2096_v6 }
 0x1eb   : > { %1954 = vmatprep.subr.mxu1 %v2096_v6 }
 0x1ec   : > { %v602_v26 = vpop.trf.xlu1 }
 0x1ed   : > { %1952 = vmatmul.mubr.msk.f32.vlgmr.msra.gmra.mrb[2].mxu1 %vm682_vm2, %v602_v26  ;;  %v1489_v26 = vld [vmem:[%s2358_s3 + $0x10] sm:$0xff] }
 0x1ee   : > { %1955 = vmatpush3.msra.mxu1 %v544_v19  ;;  %1956 = vmatprep.mubr.msk.f32.mxu1 %vm2095_vm0, %v2096_v6 }
 0x1ef   : > { %1964 = vmatprep.subr.mxu1 %v2096_v6 }
 0x1f0   : > { %v634_v27 = vpop.trf.xlu1 }
 0x1f1   : > { %1957 = vmatmul.mubr.msk.f32.vlgmr.msra.gmra.mrb[4].mxu1 %vm682_vm2, %v634_v27 }
 0x1f2   : > { %1966 = vmatprep.mubr.msk.f32.mxu1 %vm2095_vm0, %v2096_v6 }
 0x1f4   : > { %v666_v28 = vpop.trf.xlu1 }
 0x1f5   : > { %1965 = vmatpush3.xpose.msk.msra.mxu1 %vm682_vm2, %v546_v21  ;;  %1962 = vmatmul.mubr.msk.f32.vlgmr.msra.gmra.mrb[2].mxu0 %vm682_vm2, %v666_v28  ;;  %v1490_v28 = vld [vmem:[%s2358_s3 + $0x18] sm:$0xff] }
 0x1f6   : > { %1970 = vmatpush3.xpose.msk.msra.mxu0 %vm682_vm2, %v547_v22  ;;  %1974 = vmatprep.subr.mxu1 %v2096_v6 }
 0x1f7   : > { %1971 = vmatprep.mubr.msk.f32.mxu0 %vm2095_vm0, %v2096_v6  ;;  %1979 = vmatprep.subr.mxu0 %v2096_v6 }
 0x2bc   : > { %v752_v29 = vpop.f32.mrb[0].mxu1 }
 0x2bd   : > { %v975_v30 = vmul.f32 0.35355338, %v752_v29  ;;  %v1948_v31 = vpop.f32.mrb[1].mxu1  ;;  %v2035_v29 = vpack.c.bf16 %v1490_v28, %v1489_v26 }
 0x2bf   : > { %v979_v32 = vsel %vm682_vm2, %v975_v30, -inf }
 0x2c0   : > { %980 = vmax.xlane.f32.xlu1 %v979_v32  ;;  %v825_v33 = vpop.f32.mrb[2].mxu1 }
 0x2c1   : > { %v976_v34 = vmul.f32 0.35355338, %v825_v33  ;;  %v1953_v35 = vpop.f32.mrb[3].mxu1 }
 0x2c2   : > { %v1881_v35 = vld [vmem:[%s2359_s4] ss:$0 sm:$0xff] }
 0x2c3   : > { %v982_v36 = vsel %vm682_vm2, %v976_v34, -inf }
 0x2c4   : > { %983 = vmax.xlane.f32.xlu0 %v982_v36  ;;  %v898_v37 = vpop.f32.mrb[4].mxu1 }
 0x2c5   : > { %v977_v38 = vmul.f32 0.35355338, %v898_v37  ;;  %v1958_v39 = vpop.f32.mrb[5].mxu1 }
 0x2c7   : > { %v985_v40 = vsel %vm682_vm2, %v977_v38, -inf }
 0x2c8   : > { %986 = vmax.xlane.f32.xlu1 %v985_v40  ;;  %v971_v41 = vpop.f32.mrb[2].mxu0 }
 0x2c9   : > { %v978_v42 = vmul.f32 0.35355338, %v971_v41  ;;  %v1963_v43 = vpop.f32.mrb[3].mxu0 }
 0x2cb   : > { %v988_v44 = vsel %vm682_vm2, %v978_v42, -inf }
 0x2cc   : > { %989 = vmax.xlane.f32.xlu1 %v988_v44 }
 0x34d   : > { %v981_v45 = vpop.xlane.xlu1 %980 }
 0x34e   : > { %v991_v46 = vsub.f32 %v975_v30, %v981_v45 }
 0x350   : > { %v995_v47 = vmul.f32 1.442695, %v991_v46  ;;  %v1603_v46 = vld [vmem:[%s2362_s7 + $0x8] sm:$0xff] }
 0x351   : > { %v984_v48 = vpop.xlane.xlu0 %983 }
 0x352   : > { %2066 = vpow2.f32 %v995_v47  ;;  %v992_v49 = vsub.f32 %v976_v34, %v984_v48  ;;  %v1605_v48 = vld [vmem:[%s2362_s7 + $0x18] sm:$0xff] }
 0x354   : > { %v997_v50 = vmul.f32 1.442695, %v992_v49 }
 0x355   : > { %v987_v51 = vpop.xlane.xlu1 %986 }
 0x356   : > { %2068 = vpow2.f32 %v997_v50  ;;  %v993_v52 = vsub.f32 %v977_v38, %v987_v51  ;;  %v1687_v50 = vld [vmem:[%s2364_s9] sm:$0xff]  ;;  %v1688_v51 = vld [vmem:[%s2364_s9 + $0x8] sm:$0xff] }
 0x358   : > { %v999_v53 = vmul.f32 1.442695, %v993_v52  ;;  %v1689_v52 = vld [vmem:[%s2364_s9 + $0x10] sm:$0xff] }
 0x359   : > { %v990_v54 = vpop.xlane.xlu1 %989 }
 0x35a   : > { %2070 = vpow2.f32 %v999_v53  ;;  %v994_v55 = vsub.f32 %v978_v42, %v990_v54  ;;  %v2044_v53 = vpack.c.bf16 %v1688_v51, %v1687_v50  ;;  %v1690_v54 = vld [vmem:[%s2364_s9 + $0x18] sm:$0xff] }
 0x35c   : > { %v2067_v56 = vpop.eup %2066  ;;  %v1001_v57 = vmul.f32 1.442695, %v994_v55  ;;  %v2047_v55 = vpack.c.bf16 %v1690_v54, %v1689_v52 }
 0x35d   : > { %v1003_v58 = vsel %vm682_vm2, %v2067_v56, 0.0 }
 0x35e   : > { %2072 = vpow2.f32 %v1001_v57  ;;  %1004 = vadd.xlane.f32.xlu1 %v1003_v58  ;;  %v1692_v57 = vld [vmem:[%s2364_s9 + $0x28] sm:$0xff] }
 0x360   : > { %v2069_v59 = vpop.eup %2068 }
 0x361   : > { %v1006_v60 = vsel %vm682_vm2, %v2069_v59, 0.0 }
 0x362   : > { %1007 = vadd.xlane.f32.xlu1 %v1006_v60 }
 0x364   : > { %v2071_v61 = vpop.eup %2070 }
 0x365   : > { %v1009_v62 = vsel %vm682_vm2, %v2071_v61, 0.0 }
 0x366   : > { %1010 = vadd.xlane.f32.xlu1 %v1009_v62 }
 0x368   : > { %v2073_v63 = vpop.eup %2072 }
 0x369   : > { %v1012_v0 = vsel %vm682_vm2, %v2073_v63, 0.0 }
 0x36a   : > { %1013 = vadd.xlane.f32.xlu1 %v1012_v0 }
 0x3eb   : > { %v1005_v1 = vpop.xlane.xlu1 %1004 }
 0x3ec   : > { %2074 = vrcp.f32 %v1005_v1  ;;  %v1884_v1 = vld [vmem:[%s2361_s6] ss:$0 sm:$0xff] }
 0x3ef   : > { %v1008_v2 = vpop.xlane.xlu1 %1007 }
 0x3f0   : > { %2076 = vrcp.f32 %v1008_v2 }
 0x3f3   : > { %v1011_v4 = vpop.xlane.xlu1 %1010 }
 0x3f4   : > { %2078 = vrcp.f32 %v1011_v4 }
 0x3f6   : > { %v2075_v5 = vpop.eup %2074 }
 0x3f7   : > { %v1019_v7 = vmul.f32 %v2075_v5, %v2067_v56  ;;  %v1014_v9 = vpop.xlane.xlu1 %1013  ;;  %v1691_v56 = vld [vmem:[%s2364_s9 + $0x20] sm:$0xff]  ;;  %v1694_v5 = vld [vmem:[%s2364_s9 + $0x38] sm:$0xff] }
 0x3f8   : > { %2080 = vrcp.f32 %v1014_v9  ;;  %v2050_v58 = vpack.c.bf16 %v1692_v57, %v1691_v56  ;;  %v1885_v9 = vld [vmem:[%s2363_s8] ss:$0 sm:$0xff] }
 0x3f9   : > { %1967 = vmatmul.mubr.msk.f32.vlgmr.msra.gmra.mrb[6].mxu1 %vm682_vm2, %v1019_v7 }
 0x3fa   : > { %v2077_v10 = vpop.eup %2076  ;;  %1975 = vmatpush3.xpose.msk.msra.mxu1 %vm682_vm2, %v2214_v23  ;;  %1976 = vmatprep.mubr.msk.f32.mxu1 %vm2095_vm0, %v2096_v6 }
 0x3fb   : > { %v1020_v11 = vmul.f32 %v2077_v10, %v2069_v59  ;;  %2043 = vmatprep.subr.bf16.mxu1 %v2094_v3 }
 0x3fd   : > { %1972 = vmatmul.mubr.msk.f32.vlgmr.msra.gmra.mrb[4].mxu0 %vm682_vm2, %v1020_v11 }
 0x3fe   : > { %v2079_v12 = vpop.eup %2078  ;;  %1980 = vmatpush3.xpose.msk.msra.mxu0 %vm682_vm2, %v2216_v24  ;;  %1981 = vmatprep.mubr.msk.f32.mxu0 %vm2095_vm0, %v2096_v6  ;;  %v1487_v24 = vld [vmem:[%s2358_s3] sm:$0xff] }
 0x3ff   : > { %v1021_v13 = vmul.f32 %v2079_v12, %v2071_v61  ;;  %2031 = vmatprep.subr.bf16.mxu0 %v2094_v3  ;;  %v2032_v27 = vpack.c.bf16 %v1488_v25, %v1487_v24 }
 0x401   : > { %1977 = vmatmul.mubr.msk.f32.vlgmr.msra.gmra.mrb[8].mxu1 %vm682_vm2, %v1021_v13 }
 0x402   : > { %v2081_v14 = vpop.eup %2080  ;;  %2022 = vmatprep.mubr.msk.f32.mxu1 %vm2095_vm0, %v2096_v6  ;;  %2045 = vmatpush3.bf16.msra.mxu1 %v2044_v53 }
 0x403   : > { %v1022_v15 = vmul.f32 %v2081_v14, %v2073_v63  ;;  %2046 = vmatprep.subr.bf16.mxu1 %v2094_v3  ;;  %v1883_v63 = vld [vmem:[%s2360_s5] ss:$0 sm:$0xff] }
 0x404   : > { %v1887_v14 = vld [vmem:[%s2365_s10] ss:$0 sm:$0xff] }
 0x405   : > { %1982 = vmatmul.mubr.msk.f32.vlgmr.msra.gmra.mrb[6].mxu0 %vm682_vm2, %v1022_v15 }
 0x406   : > { %1992 = vmatprep.mubr.msk.f32.mxu0 %vm2095_vm0, %v2096_v6  ;;  %2033 = vmatpush3.bf16.msra.mxu0 %v2032_v27 }
 0x407   : > { %2034 = vmatprep.subr.bf16.mxu0 %v2094_v3  ;;  %2048 = vmatpush3.bf16.msra.mxu1 %v2047_v55 }
 0x408   : > { %2049 = vmatprep.subr.bf16.mxu1 %v2094_v3 }
 0x40a   : > { %2036 = vmatpush3.bf16.msra.mxu0 %v2035_v29  ;;  %v1889_v29 = vld [vmem:[%s2366_s11] ss:$0 sm:$0xff] }
 0x40b   : > { %2037 = vmatprep.subr.bf16.mxu0 %v2094_v3  ;;  %2051 = vmatpush3.bf16.msra.mxu1 %v2050_v58 }
 0x40c   : > { %2052 = vmatprep.subr.bf16.mxu1 %v2094_v3 }
 0x4cc   : > { %v1095_v16 = vpop.f32.mrb[6].mxu1 }
 0x4cd   : > { %1327 = vxpose.xlu1.b32.start.end [1/1] (short) (narrow) %v1095_v16, 8  ;;  %v1968_v17 = vpop.f32.mrb[7].mxu1 }
 0x4d0   : > { %v1171_v18 = vpop.f32.mrb[4].mxu0 }
 0x4d1   : > { %1359 = vxpose.xlu0.b32.start.end [1/1] (short) (narrow) %v1171_v18, 8  ;;  %v1973_v19 = vpop.f32.mrb[5].mxu0 }
 0x4d4   : > { %v1247_v20 = vpop.f32.mrb[8].mxu1 }
 0x4d5   : > { %1391 = vxpose.xlu1.b32.start.end [1/1] (short) (narrow) %v1247_v20, 8  ;;  %v1978_v21 = vpop.f32.mrb[9].mxu1 }
 0x4d8   : > { %v1323_v22 = vpop.f32.mrb[6].mxu0 }
 0x4d9   : > { %1423 = vxpose.xlu1.b32.start.end [1/1] (short) (narrow) %v1323_v22, 8  ;;  %v1983_v23 = vpop.f32.mrb[7].mxu0 }
 0x54d   : > { %v1343_v30 = vpop.trf.xlu1 }
 0x54e   : > { %1455 = vxpose.xlu1.b32.start [1/4] (short) (narrow) %v1343_v30, 8 }
 0x551   : > { %v1375_v31 = vpop.trf.xlu0 }
 0x552   : > { %1456 = vxpose.xlu1.b32.cont [2/4] (short) (narrow) %v1375_v31, 8  ;;  %v1890_v31 = vld [vmem:[%s2367_s12] ss:$0 sm:$0xff] }
 0x555   : > { %v1407_v32 = vpop.trf.xlu1 }
 0x556   : > { %1457 = vxpose.xlu1.b32.cont [3/4] (short) (narrow) %v1407_v32, 8 }
 0x559   : > { %v1439_v33 = vpop.trf.xlu1 }
 0x55a   : > { %1458 = vxpose.xlu1.b32.end [4/4] (short) (narrow) %v1439_v33, 8 }
 0x5ce   : > { %v1471_v34 = vpop.trf.xlu1 }
 0x5cf   : > { %1993 = vmatmul.mubr.msk.f32.vlgmr.msra.gmra.mrb[8].mxu0 %vm448_vm1, %v1471_v34 }
 0x5d0   : > { %2003 = vmatprep.mubr.msk.f32.mxu0 %vm2095_vm0, %v2096_v6  ;;  %v1602_v6 = vld [vmem:[%s2362_s7] sm:$0xff] }
 0x5d1   : > { %v2038_v47 = vpack.c.bf16 %v1603_v46, %v1602_v6 }
 0x5d3   : > { %2039 = vmatpush3.bf16.msra.mxu0 %v2038_v47 }
 0x5d4   : > { %2040 = vmatprep.subr.bf16.mxu0 %v2094_v3  ;;  %v1693_v3 = vld [vmem:[%s2364_s9 + $0x30] sm:$0xff] }
 0x5d5   : > { %v2053_v7 = vpack.c.bf16 %v1694_v5, %v1693_v3 }
 0x5d7   : > { %2054 = vmatpush3.bf16.msra.mxu1 %v2053_v7 }
 0x6a2   : > { %v1567_v36 = vpop.f32.mrb[8].mxu0 }
 0x6a3   : > { %v1568_v37 = vadd.f32 %v1881_v35, %v1567_v36  ;;  %v1994_v38 = vpop.f32.mrb[9].mxu0 }
 0x6a5   : > { %v1571_v39 = vadd.f32 %v1568_v37, %v2202_v8  ;;  %v1604_v8 = vld [vmem:[%s2362_s7 + $0x10] sm:$0xff] }
 0x6a6   : > { %v2041_v49 = vpack.c.bf16 %v1605_v48, %v1604_v8 }
 0x6a7   : > { %v1574_v40 = vsel %vm448_vm1, %v1571_v39, 0.0 }
 0x6a8   : > { %1575 = vadd.xlane.f32.xlu0 %v1574_v40  ;;  %2042 = vmatpush3.bf16.msra.mxu0 %v2041_v49 }
 0x735   : > { %v1576_v41 = vpop.xlane.xlu0 %1575 }
 0x736   : > { %v1578_v42 = vmul.f32 0.03125, %v1576_v41 }
 0x738   : > { %v1579_v43 = vsub.f32 %v1571_v39, %v1578_v42 }
 0x73a   : > { %v1580_v44 = vmul.f32 %v1579_v43, %v1579_v43 }
 0x73c   : > { %v1581_v45 = vsel %vm448_vm1, %v1580_v44, 0.0 }
 0x73d   : > { %1582 = vadd.xlane.f32.xlu1 %v1581_v45 }
 0x7ca   : > { %v1583_v59 = vpop.xlane.xlu1 %1582 }
 0x7cb   : > { %v1584_v60 = vmul.f32 0.03125, %v1583_v59 }
 0x7cd   : > { %v1585_v61 = vadd.f32 1e-05, %v1584_v60 }
 0x7cf   : > { %2082 = vrsqrt.f32 %v1585_v61 }
 0x7d9   : > { %v2083_v62 = vpop.eup %2082 }
 0x7da   : > { %v1587_v0 = vmul.f32 %v2083_v62, %v1579_v43 }
 0x7dc   : > { %v1594_v2 = vmul.f32 %v1883_v63, %v1587_v0 }
 0x7de   : > { %v1601_v4 = vadd.f32 %v1884_v1, %v1594_v2 }
 0x7e0   : > { %2004 = vmatmul.mubr.msk.f32.vlgmr.msra.gmra.mrb[10].mxu0 %vm448_vm1, %v1601_v4 }
 0x8b3   : > { %v1682_v10 = vpop.f32.mrb[10].mxu0 }
 0x8b4   : > { %v1683_v11 = vadd.f32 %v1885_v9, %v1682_v10  ;;  %v2005_v12 = vpop.f32.mrb[11].mxu0 }
 0x8b6   : > { %v1686_v13 = vmax.f32 %v1683_v11, 0.0 }
 0x8b8   : > { %2023 = vmatmul.mubr.msk.f32.vlgmr.msra.gmra.mrb[10].mxu1 %vm1702_vm3, %v1686_v13 }
 0x98b   : > { %v1772_v15 = vpop.f32.mrb[10].mxu1 }
 0x98c   : > { %v1773_v16 = vadd.f32 %v1887_v14, %v1772_v15  ;;  %v2024_v17 = vpop.f32.mrb[11].mxu1 }
 0x98e   : > { %v1776_v18 = vadd.f32 %v1773_v16, %v1601_v4 }
 0x990   : > { %v1779_v19 = vsel %vm448_vm1, %v1776_v18, 0.0 }
 0x991   : > { %1780 = vadd.xlane.f32.xlu0 %v1779_v19 }
 0xa1e   : > { %v1781_v20 = vpop.xlane.xlu0 %1780 }
 0xa1f   : > { %v1782_v21 = vmul.f32 0.03125, %v1781_v20 }
 0xa21   : > { %v1783_v22 = vsub.f32 %v1776_v18, %v1782_v21 }
 0xa23   : > { %v1784_v23 = vmul.f32 %v1783_v22, %v1783_v22 }
 0xa25   : > { %v1785_v24 = vsel %vm448_vm1, %v1784_v23, 0.0 }
 0xa26   : > { %1786 = vadd.xlane.f32.xlu0 %v1785_v24 }
 0xab3   : > { %v1787_v25 = vpop.xlane.xlu0 %1786 }
 0xab4   : > { %v1788_v26 = vmul.f32 0.03125, %v1787_v25 }
 0xab6   : > { %v1789_v27 = vadd.f32 1e-05, %v1788_v26 }
 0xab8   : > { %2084 = vrsqrt.f32 %v1789_v27 }
 0xac2   : > { %v2085_v28 = vpop.eup %2084 }
 0xac3   : > { %v1791_v30 = vmul.f32 %v2085_v28, %v1783_v22 }
 0xac5   : > { %v1798_v32 = vmul.f32 %v1889_v29, %v1791_v30 }
 0xac7   : > { %v1805_v33 = vadd.f32 %v1890_v31, %v1798_v32 }
 0xac9   : > { %1806 = vst.msk [vmem:[%s435_s15] sm:$0xff] %vm448_vm1, %v1805_v33 }
 0xaca PF: > { %s23_s25 = sadd.s32 1, %s2092_s25  }
 0xacb   : > { %p20_p4 = scmp.ge.s32.totalorder %s23_s25, 4  }
 0xacd   :  { %22 = sbr.rel (!%p20_p4) target bundleno = 1 (0x1), region = 102 }

</bundles_post_ra>
